<compile_context>
chip_gen: v7x
topology: tpu7x:2x2x1
jax: 0.10.0
libtpu: 0.0.40
codegen_flags: <defaults>
</compile_context>

<pallas_src>
import jax
import jax.numpy as jnp
from jax import lax
from jax.experimental import pallas as pl
from jax.experimental.pallas import tpu as pltpu


def _fc_kernel(x_ref, w_ref, b_ref, o_ref):
    # x_ref: (B, D)   bf16, full block (tiny, resident every step)
    # w_ref: (tn, D)  bf16, one row-tile of the torch-layout (N, D) weight
    # b_ref: (1, tn)  f32, matching bias tile
    # o_ref: (B, tn)  f32
    acc = lax.dot_general(
        x_ref[...], w_ref[...],
        dimension_numbers=(((1,), (1,)), ((), ())),   # contract D with D
        preferred_element_type=jnp.float32,
    )
    o_ref[...] = (acc + b_ref[...]).astype(o_ref.dtype)


def _pick_tn(N, D, *, bytes_per_weight_elem=2,
             weight_vmem_budget=16 * 1024 * 1024, max_tn=2048):
    """Pick the output tile width.

    Largest multiple of 128 that divides N, fits the double-buffered weight
    tile inside `weight_vmem_budget`, is <= max_tn, and (if possible) leaves
    at least 2 grid steps for megacore sharding on v7x.  Falls back to a
    single full-width tile when N is small / not a multiple of 128 (full-dim
    blocks are always legal).
    """
    if N < 128 or N % 128 != 0:
        return N
    cap = max(128, min(max_tn,
                       weight_vmem_budget // (2 * D * bytes_per_weight_elem)))
    candidates = [t for t in range(128, N + 1, 128) if N % t == 0 and t <= cap]
    if not candidates:
        return N
    multi_step = [t for t in candidates if N // t >= 2]
    return max(multi_step) if multi_step else max(candidates)


def clip_conditioner_forward(x, weight, bias, out_channels, height, width, *,
                             tn=None):
    """x: (B, clip_dim).  weight: (N, clip_dim) torch-style.  bias: (N,).
    Returns (B, out_channels, height, width) float32."""
    B, D = x.shape
    N = out_channels * height * width
    assert weight.shape == (N, D) and bias.shape == (N,)

    if tn is None:
        tn = _pick_tn(N, D)
    assert N % tn == 0

    # Stream the bandwidth-bound operands in bf16; accumulate in f32.
    x_bf = x.astype(jnp.bfloat16)                      # x = x.float() then bf16 stream
    w_bf = weight.astype(jnp.bfloat16)                 # (N, D), torch layout, no transpose
    b2 = bias.astype(jnp.float32).reshape(1, N)        # (1, N)

    out_flat = pl.pallas_call(
        _fc_kernel,
        out_shape=jax.ShapeDtypeStruct((B, N), jnp.float32),
        grid_spec=pltpu.PrefetchScalarGridSpec(
            num_scalar_prefetch=0,
            grid=(N // tn,),
            in_specs=[
                pl.BlockSpec((B, D), lambda j: (0, 0)),     # full x every tile (tiny)
                pl.BlockSpec((tn, D), lambda j: (j, 0)),    # weight row-tile, (N, D) layout
                pl.BlockSpec((1, tn), lambda j: (0, j)),    # bias tile
            ],
            out_specs=pl.BlockSpec((B, tn), lambda j: (0, j)),
        ),
        compiler_params=pltpu.CompilerParams(
            dimension_semantics=("parallel",),
            vmem_limit_bytes=32 * 1024 * 1024,              # safe on v5e/v6e/v7x
        ),
    )(x_bf, w_bf, b2)

    # out.view(B, C, H, W) -- row-major, identical to torch .view
    return out_flat.reshape(B, out_channels, height, width)


def _reference(x, weight, bias, out_channels, height, width):
    x = x.astype(jnp.float32)
    out = x @ weight.T.astype(jnp.float32) + bias.astype(jnp.float32)
    return out.reshape(x.shape[0], out_channels, height, width)


if __name__ == "__main__":
    # Small shapes consistent with the module.
    B = 2
    clip_dim = 32
    out_channels = 4
    height = 8
    width = 8
    N = out_channels * height * width  # 256

    key = jax.random.PRNGKey(0)
    kx, kw, kb = jax.random.split(key, 3)

    # Deterministic synthetic parameters (same shapes as torch.nn.Linear).
    x = jax.random.normal(kx, (B, clip_dim), dtype=jnp.float32)
    weight = jax.random.normal(kw, (N, clip_dim), dtype=jnp.float32) * 0.02
    bias = jax.random.normal(kb, (N,), dtype=jnp.float32) * 0.01

    out = clip_conditioner_forward(x, weight, bias, out_channels, height, width)
    out = jax.block_until_ready(out)

    ref = _reference(x, weight, bias, out_channels, height, width)
    assert out.shape == (B, out_channels, height, width)
    # bf16 weight/x streaming with f32 accumulation: loosened tolerance vs f32 ref.
    assert jnp.allclose(out, ref, atol=2e-2, rtol=2e-2), "mismatch vs reference"

    print("KERNEL_OK")
</pallas_src>

<mosaic_0001>
module attributes {stable_mosaic.version = 11 : i64} {
  func.func @_fc_kernel(%arg0: i32, %arg1: memref<2x32xbf16, #tpu.memory_space<vmem>>, %arg2: memref<128x32xbf16, #tpu.memory_space<vmem>>, %arg3: memref<1x128xf32, #tpu.memory_space<vmem>>, %arg4: memref<2x128xf32, #tpu.memory_space<vmem>>) attributes {dimension_semantics = [#tpu.dimension_semantics<parallel>], iteration_bounds = array<i64: 2>, scalar_prefetch = 0 : i64, scratch_operands = 0 : i64, tpu.core_type = #tpu.core_type<tc>, window_params = [{pipeline_mode = #tpu.pipeline_mode<synchronous>, transform_indices = @transform_0, window_bounds = array<i64: 2, 32>}, {transform_indices = @transform_1, window_bounds = array<i64: 128, 32>}, {transform_indices = @transform_2, window_bounds = array<i64: 1, 128>}, {transform_indices = @transform_3, window_bounds = array<i64: 2, 128>}]} {
    %c0 = arith.constant 0 : index
    %c0_0 = arith.constant 0 : index
    %0 = vector.load %arg1[%c0, %c0_0] : memref<2x32xbf16, #tpu.memory_space<vmem>>, vector<2x32xbf16>
    %c0_1 = arith.constant 0 : index
    %c0_2 = arith.constant 0 : index
    %1 = vector.load %arg2[%c0_1, %c0_2] : memref<128x32xbf16, #tpu.memory_space<vmem>>, vector<128x32xbf16>
    %cst = arith.constant dense<0.000000e+00> : vector<2x128xf32>
    %2 = tpu.matmul %0, %1, %cst {dimension_numbers = #tpu.dot_dimension_numbers<[1], [1], [0], [0], [0, 0, 1, 0], [], []>} : vector<2x32xbf16>, vector<128x32xbf16>, vector<2x128xf32> -> vector<2x128xf32>
    %c0_3 = arith.constant 0 : index
    %c0_4 = arith.constant 0 : index
    %3 = vector.load %arg3[%c0_3, %c0_4] : memref<1x128xf32, #tpu.memory_space<vmem>>, vector<1x128xf32>
    %4 = vector.broadcast %3 : vector<1x128xf32> to vector<2x128xf32>
    %5 = arith.addf %2, %4 : vector<2x128xf32>
    %c0_5 = arith.constant 0 : index
    %c0_6 = arith.constant 0 : index
    %6 = vector.load %arg4[%c0_5, %c0_6] : memref<2x128xf32, #tpu.memory_space<vmem>>, vector<2x128xf32>
    tpu.vector_store %arg4[%c0_5, %c0_6], %5 {strides = array<i32>} : memref<2x128xf32, #tpu.memory_space<vmem>>, vector<2x128xf32>,
    return
  }
  func.func @transform_0(%arg0: i32) -> (i32, i32) {
    %c0_i32 = arith.constant 0 : i32
    %c0_i32_0 = arith.constant 0 : i32
    %c0_i32_1 = arith.constant 0 : i32
    return %c0_i32, %c0_i32_0 : i32, i32
  }
  func.func @transform_1(%arg0: i32) -> (i32, i32) {
    %c0_i32 = arith.constant 0 : i32
    %c0_i32_0 = arith.constant 0 : i32
    return %arg0, %c0_i32 : i32, i32
  }
  func.func @transform_2(%arg0: i32) -> (i32, i32) {
    %c0_i32 = arith.constant 0 : i32
    %c0_i32_0 = arith.constant 0 : i32
    return %c0_i32, %arg0 : i32, i32
  }
  func.func @transform_3(%arg0: i32) -> (i32, i32) {
    %c0_i32 = arith.constant 0 : i32
    %c0_i32_0 = arith.constant 0 : i32
    return %c0_i32, %arg0 : i32, i32
  }
}

</mosaic_0001>

<bundles_post_ra>
// kernel: tpu_custom_call.1
= control target key start
LH: loop header
LB: loop body
LE: loop exit
PB: predicated region body
PF: predicated region fallthrough
CT: control target
= control target key end

     0   :  { %8 = vsyncpa [#allocation3], 0  ;;  %s703_s0 = inlined_call_operand.vmem [shape: bf16[2,32], index: 0, kind: input, shape index: {}]   ;;  %s704_s1 = inlined_call_operand.vmem [shape: bf16[256,32], index: 1, kind: input, shape index: {}]   ;;  %s705_s2 = inlined_call_operand.vmem [shape: f32[1,256], index: 2, kind: input, shape index: {}]   ;;  %s706_s3 = inlined_call_operand.hbm [shape: f32[2,256], index: 3, kind: output, shape index: {}]  }
   0x1   :  { %10 = vsyncpa [#allocation3 + $0x1], 0  ;;  %s587_s12 = smov 0   ;;  %s589_s13 = smov 0  }
   0x2   :  { %s591_s14 = smov 0   ;;  %s593_s15 = smov 0  }
   0x3 LB: > { %s608_s16 = sadd.s32 4294967295, %s562_s15   ;;  %s401_s17 = sadd.s32 4294967294, %s562_s15   ;;  %s562_s15 = sphi %s593_s15, %s712_s15   ;;  %s558_s14 = sphi %s591_s14, %s711_s14   ;;  %s554_s13 = sphi %s589_s13, %s710_s13   ;;  %s550_s12 = sphi %s587_s12, %s709_s12  }
   0x4   : > { %s612_s18 = sadd.s32 1, %s562_s15   ;;  %s96_s19 = sadd.s32 1, %s558_s14 }
   0x5   : > { %s93_s20 = ssub.s32 %s562_s15, %s612_s18  ;;  %p106_p0 = scmp.ne.s32.totalorder %s558_s14, %s554_s13 }
   0x6   : > { %p94_p1 = scmp.eq.s32.totalorder %s93_s20, 0  ;;  %p107_p2 = scmp.eq.s32.totalorder %s608_s16, 1 }
   0x7   : > { %p112_p3 = scmp.ne.s32.totalorder %s554_s13, %s550_s12  ;;  %p113_p4 = scmp.eq.s32.totalorder %s401_s17, 1 }
   0x8   : > { %s623_s21 = scalar_select %p94_p1, %s558_s14, %s96_s19  }
   0x9   : > { %p625_p5 = por %p107_p2, %p106_p0  ;;  %p629_p6 = por %p113_p4, %p112_p3 }
   0xa   : > { %p404_p7 = scmp.ge.s32.totalorder %s562_s15, 1  ;;  %p149_p8 = scmp.lt.s32.totalorder %s562_s15, 3 }
   0xc   : > { %p150_p9 = pnand %p404_p7, %p149_p8 }
   0xd   : > { %s406_s24 = sshll.u32 (!%p150_p9), %s608_s16, 4  ;;  %v564_v0 = vmov (!%p150_p9), 0.0   ;;  %vm565_vm0 = vmmov (!%p150_p9), 0   ;;  %vm250_vm1 = vcmask (!%p150_p9), 261120   ;;  %v186_v17 = vld [vmem:[%s703_s0] sm:$0x1] (!%p150_p9) }
   0xe   : > { %153 = sbr.rel (%p150_p9) target bundleno = 317 (0x13d), region = 32  ;;  %431 = vmatprep.subr.bf16.mxu0 (!%p150_p9), %v564_v0  ;;  %p177_p10 = scmp.lt.s32.totalorder (!%p150_p9), %s406_s24, 31  ;;  %447 = vmatprep.mubr.msk.bf16.mxu0 (!%p150_p9), %vm565_vm0, %v564_v0 }
   0xf   : > { %p182_p11 = scmp.lt.s32.totalorder (!%p150_p9), %s608_s16, 1  ;;  %s173_s4 = sand.u32 (!%p150_p9), 1, %s554_s13  }
  0x10   : > { %s405_s6 = sshll.u32 (!%p150_p9), %s173_s4, 1  ;;  %s419_s10 = sshll.u32 (!%p150_p9), %s608_s16, 5 }
  0x11   : > { %s175_s11 = scalar_lea.vmem (!%p150_p9), [#allocation2], %s405_s6  ;;  %s566_s26 = smov (!%p150_p9), [#allocation2]  }
  0x12   : > { %s333_s17 = sshll.u32 (!%p150_p9), %s175_s11, 4  ;;  %s504_s27 = sshll.u32 (!%p150_p9), %s566_s26, 4  ;;  %s663_s17 = int_to_ptr.vmem [resolvable:$true] %s333_s17  ;;  %s505_s27 = int_to_ptr.vmem [resolvable:$false] %s504_s27 }
  0x13   : > { %p507_p1 = scmp.lt.s32.totalorder (!%p150_p9), %s663_s17, %s505_s27 }
  0x15   : > { %s714_s24 = smov (!%p177_p10, %s406_s24), 31 }
  0x16   : > { %s407_s25 = sshll.u32 %s714_s24, 2  ;;  %s661_s24 = scalar_lea.hbm %s706_s3, %s419_s10 }
  0x17   : > { %s180_s28 = scalar_lea.vmem %s704_s1, %s407_s25  ;;  %s320_s25 = scalar_lea.sflag [#allocation3], %s173_s4 }
  0x18   : > { %v492_v1 = vld [vmem:[%s180_s28] sm:$0xff]   ;;  %v493_v3 = vld [vmem:[%s180_s28 + $0x8] sm:$0xff]   ;;  %v494_v5 = vld [vmem:[%s180_s28 + $0x10] sm:$0xff]   ;;  %s183_s5 = scalar_select %p182_p11, %s608_s16, 1 }
  0x19   : > { %v255_v2 = vsel %vm250_vm1, %v492_v1, 0  ;;  %v258_v4 = vsel %vm250_vm1, %v493_v3, 0  ;;  %v261_v6 = vsel %vm250_vm1, %v494_v5, 0  ;;  %v495_v7 = vld [vmem:[%s180_s28 + $0x18] sm:$0xff]   ;;  %v496_v9 = vld [vmem:[%s180_s28 + $0x20] sm:$0xff]   ;;  %v497_v11 = vld [vmem:[%s180_s28 + $0x28] sm:$0xff]  }
  0x1a   : > { %432 = vmatpush3.bf16.xpose.msra.mxu0 %v255_v2  ;;  %v264_v8 = vsel %vm250_vm1, %v495_v7, 0  ;;  %v267_v10 = vsel %vm250_vm1, %v496_v9, 0  ;;  %v270_v12 = vsel %vm250_vm1, %v497_v11, 0  ;;  %v498_v13 = vld [vmem:[%s180_s28 + $0x30] sm:$0xff]   ;;  %v499_v15 = vld [vmem:[%s180_s28 + $0x38] sm:$0xff]   ;;  %s184_s9 = scalar_lea.vmem %s705_s2, %s183_s5  ;;  %s500_s16 = scalar_lea.vmem %s663_s17, 32 }
  0x1b   : > { %433 = vmatprep.subr.bf16.mxu0 %v564_v0  ;;  %v273_v14 = vsel %vm250_vm1, %v498_v13, 0  ;;  %v276_v16 = vsel %vm250_vm1, %v499_v15, 0  ;;  %v408_v18 = vld [vmem:[%s184_s9] ss:$0 sm:$0xff]  ;;  %p501_p12 = scmp.ne.s32.totalorder %s663_s17, %s500_s16  ;;  %s506_s28 = scalar_lea.vmem %s505_s27, 64 }
  0x1c   : > { %p508_p2 = scmp.lt.s32.totalorder %s506_s28, %s500_s16 }
  0x1d   : > { %p502_p13 = pnand %p501_p12, %p625_p5 }
  0x1e   : > { %p509_p3 = por %p508_p2, %p507_p1 }
  0x1f   : > { %p503_p0 = pneg %p502_p13 }
  0x21   : > { %p510_p4 = pnand %p509_p3, %p503_p0 }
  0x22   : > { %434 = vmatpush3.bf16.xpose.msra.mxu0 %v258_v4 }
  0x23   : > { %435 = vmatprep.subr.bf16.mxu0 %v564_v0 }
  0x2a   : > { %436 = vmatpush3.bf16.xpose.msra.mxu0 %v261_v6 }
  0x2b   : > { %437 = vmatprep.subr.bf16.mxu0 %v564_v0 }
  0x32   : > { %438 = vmatpush3.bf16.xpose.msra.mxu0 %v264_v8 }
  0x33   : > { %439 = vmatprep.subr.bf16.mxu0 %v564_v0 }
  0x3a   : > { %440 = vmatpush3.bf16.xpose.msra.mxu0 %v267_v10 }
  0x3b   : > { %441 = vmatprep.subr.bf16.mxu0 %v564_v0 }
  0x42   : > { %442 = vmatpush3.bf16.xpose.msra.mxu0 %v270_v12 }
  0x43   : > { %443 = vmatprep.subr.bf16.mxu0 %v564_v0 }
  0x4a   : > { %444 = vmatpush3.bf16.xpose.msra.mxu0 %v273_v14 }
  0x4b   : > { %445 = vmatprep.subr.bf16.mxu0 %v564_v0 }
  0x52   : > { %446 = vmatpush3.bf16.xpose.msra.mxu0 %v276_v16 }
  0x59   : > { %448 = vmatmul.mubr.msk.bf16.vlgmr.msra.gmra.mrb[0].mxu0 %vm250_vm1, %v186_v17 }
 0x12c   : > { %v312_v19 = vpop.f32.mrb[0].mxu0 }
 0x12d   : > { %v313_v20 = vadd.f32 %v408_v18, %v312_v19  ;;  %v449_v21 = vpop.f32.mrb[1].mxu0 }
 0x12e   : > { %v315_v22 = vpop.f32.mrb[2].mxu0 }
 0x12f   : > { %318 = vst [vmem:[%s175_s11] sm:$0x3] %v313_v20  ;;  %v450_v23 = vpop.f32.mrb[3].mxu0 }
 0x130   : > { %513 = shalt.err (!%p510_p4)
}
 0x131   : > { %s514_s29 = scalar_lea.hbm %s661_s24, 32  ;;  %s518_s5 = scalar_lea.hbm %s706_s3, 64 }
 0x132   : > { %p515_p7 = scmp.ne.s32.totalorder %s661_s24, %s514_s29  ;;  %p519_p10 = scmp.lt.u32.totalorder %s661_s24, %s706_s3 }
 0x133   : > { %p520_p11 = scmp.lt.u32.totalorder %s518_s5, %s514_s29  ;;  %p522_p13 = scmp.lt.u32.totalorder %s514_s29, %s661_s24 }
 0x134   : > { %p516_p8 = pnand %p515_p7, %p625_p5 }
 0x135   : > { %p521_p12 = por %p520_p11, %p519_p10 }
 0x136   : > { %p517_p9 = pneg %p516_p8 }
 0x137   : > { %p523_p0 = por %p522_p13, %p521_p12 }
 0x139   : > { %p524_p1 = pnand %p523_p0, %p517_p9 }
 0x13b   : > { %527 = shalt.err (!%p524_p1)
}
 0x13c   : > { %451 = dma.vmem_to_hbm [thread:$0]  (%p625_p5), %s663_s17, 32, %s661_s24, %s320_s25  }
 0x13d PF: > { %p457_p2 = scmp.ge.s32.totalorder %s562_s15, 2  ;;  %s345_s8 = sand.u32 1, %s550_s12  }
 0x13e   : > { %s346_s9 = scalar_lea.sflag [#allocation3], %s345_s8 }
 0x13f   : > { %p454_p3 = pnand %p457_p2, %p629_p6 }
 0x141   : > { %545 = dma.done.wait (!%p454_p3), %s346_s9, 32  }
 0x142   : > { %547 = vsyncadd (!%p454_p3), %s346_s9, 4294967264  ;;  %p13_p4 = scmp.ge.s32.totalorder %s612_s18, 4   ;;  %s709_s12 = smov %s554_s13 }
 0x143   : > { %s710_s13 = smov %s558_s14  ;;  %s711_s14 = smov %s623_s21 }
 0x144   : > { %s712_s15 = smov %s612_s18  ;;  %15 = sbr.rel (!%p13_p4) target bundleno = 3 (0x3), region = 70 }
 0x14b   :  { %351 = vsyncpa [#allocation3], 1 }
 0x14c   :  { %353 = vsyncpa [#allocation3 + $0x1], 1 }

</bundles_post_ra>
